<compile_context>
chip_gen: v6e
topology: v6e:2x2x1
jax: 0.10.0
libtpu: 0.0.40
codegen_flags: <defaults>
</compile_context>

<pallas_src>
import jax
import jax.numpy as jnp
from jax import lax
from jax.experimental import pallas as pl
from jax.experimental.pallas import tpu as pltpu


def _round_up(x, m):
    return ((x + m - 1) // m) * m


def _policy_kernel(x_ref, w1_ref, b1_ref, w2_ref, b2_ref, w3_ref, b3_ref, oT_ref):
    # x_ref:  [TILE_B, num_inputs]   (natural HBM layout, no wrapper transpose)
    # wN_ref: [out, in] (PyTorch layout), bN_ref: [out, 1]
    # oT_ref: [num_actions, TILE_B]  (batch on lanes -> dense, unmasked stores)
    x = x_ref[...]

    # Layer 1: contract the shared feature axis (W1 dim 1 with x dim 1) so the
    # result lands directly as [hidden, TILE_B] — batch on the lane axis — with
    # no HBM-side transpose; the operand relayout happens on the idle XLU.
    h1 = lax.dot_general(
        w1_ref[...], x,
        dimension_numbers=(((1,), (1,)), ((), ())),
        preferred_element_type=jnp.float32,
    ) + b1_ref[...]
    h1 = jnp.maximum(h1, 0.0)

    h2 = jnp.dot(w2_ref[...], h1, preferred_element_type=jnp.float32) + b2_ref[...]
    h2 = jnp.maximum(h2, 0.0)

    m = jnp.dot(w3_ref[...], h2, preferred_element_type=jnp.float32) + b3_ref[...]
    oT_ref[...] = jnp.tanh(m).astype(oT_ref.dtype)


def deterministic_policy_forward(state, params, tile_b=8192):
    """state: [B, num_inputs] f32.  params: dict of (W, b), W as [out, in], b as [out, 1]."""
    w1, b1 = params["linear1"]
    w2, b2 = params["linear2"]
    w3, b3 = params["mean"]

    B, num_inputs = state.shape
    hidden = w1.shape[0]
    num_actions = w3.shape[0]

    # Pad the batch only to a lane multiple (128); ragged tails are handled by
    # a partial last tile rather than padding all the way up to tile_b.
    b_pad = _round_up(B, 128)
    x = state if b_pad == B else jnp.pad(state, ((0, b_pad - B), (0, 0)))

    # Tile selection: as large as requested, but (a) a multiple of 128 lanes
    # and (b) at least two tiles so both TensorCores get work on v7x.
    tile_b = _round_up(max(tile_b, 128), 128)
    tile_b = min(tile_b, max(128, _round_up(pl.cdiv(b_pad, 2), 128)))
    tile_b = min(tile_b, b_pad)
    grid = (pl.cdiv(b_pad, tile_b),)

    # Only the traffic this pallas_call actually generates (no transpose copies).
    weight_bytes = 4 * (num_inputs * hidden + hidden * hidden + hidden * num_actions
                        + 2 * hidden + num_actions)
    cost = pl.CostEstimate(
        flops=2 * b_pad * (num_inputs * hidden + hidden * hidden + hidden * num_actions),
        transcendentals=b_pad * num_actions,
        bytes_accessed=4 * b_pad * (num_inputs + num_actions) + weight_bytes,
    )

    outT = pl.pallas_call(
        _policy_kernel,
        out_shape=jax.ShapeDtypeStruct((num_actions, b_pad), jnp.float32),
        grid=grid,
        in_specs=[
            pl.BlockSpec((tile_b, num_inputs), lambda i: (i, 0)),     # x tile (pipelined)
            pl.BlockSpec((hidden, num_inputs), lambda i: (0, 0)),     # W1 resident in VMEM
            pl.BlockSpec((hidden, 1), lambda i: (0, 0)),              # b1 resident
            pl.BlockSpec((hidden, hidden), lambda i: (0, 0)),         # W2 resident
            pl.BlockSpec((hidden, 1), lambda i: (0, 0)),              # b2 resident
            pl.BlockSpec((num_actions, hidden), lambda i: (0, 0)),    # W3 resident
            pl.BlockSpec((num_actions, 1), lambda i: (0, 0)),         # b3 resident
        ],
        out_specs=pl.BlockSpec((num_actions, tile_b), lambda i: (0, i)),
        compiler_params=pltpu.CompilerParams(
            dimension_semantics=("parallel",),   # shard batch tiles across TCs (v7x)
        ),
        cost_estimate=cost,
    )(x, w1, b1, w2, b2, w3, b3)

    # Small [num_actions, B] transpose outside the kernel (cheaper than a
    # non-lane-dense store path inside it).
    return outT.T[:B]


def _xavier_uniform(key, out_features, in_features):
    # torch.nn.init.xavier_uniform_(gain=1): U(-a, a), a = sqrt(6/(fan_in+fan_out)).
    bound = (6.0 / (in_features + out_features)) ** 0.5
    return jax.random.uniform(key, (out_features, in_features), jnp.float32, -bound, bound)


def init_params(key, num_inputs, num_actions, hidden_dim):
    k1, k2, k3 = jax.random.split(key, 3)
    return {
        "linear1": (_xavier_uniform(k1, hidden_dim, num_inputs),
                    jnp.zeros((hidden_dim, 1), jnp.float32)),
        "linear2": (_xavier_uniform(k2, hidden_dim, hidden_dim),
                    jnp.zeros((hidden_dim, 1), jnp.float32)),
        "mean":    (_xavier_uniform(k3, num_actions, hidden_dim),
                    jnp.zeros((num_actions, 1), jnp.float32)),
    }


if __name__ == "__main__":
    key = jax.random.PRNGKey(0)
    k_state, k_params = jax.random.split(key)

    num_inputs, num_actions, hidden_dim = 16, 8, 32
    params = init_params(k_params, num_inputs, num_actions, hidden_dim)

    w1, b1 = params["linear1"]
    w2, b2 = params["linear2"]
    w3, b3 = params["mean"]

    def ref_forward(s):
        h1 = jnp.maximum(s @ w1.T + b1[:, 0], 0.0)
        h2 = jnp.maximum(h1 @ w2.T + b2[:, 0], 0.0)
        return jnp.tanh(h2 @ w3.T + b3[:, 0])

    # Case 1: batch divisible by the tile — two full 256-lane tiles.
    state = jax.random.normal(k_state, (512, num_inputs), jnp.float32)
    mean = jax.block_until_ready(deterministic_policy_forward(state, params, tile_b=256))
    assert mean.shape == (512, num_actions)
    assert jnp.allclose(mean, ref_forward(state), atol=1e-5, rtol=1e-5)

    # Case 2: ragged batch — padded to 384 lanes, partial last tile via pl.cdiv grid.
    state2 = jax.random.normal(k_state, (300, num_inputs), jnp.float32)
    mean2 = jax.block_until_ready(deterministic_policy_forward(state2, params, tile_b=256))
    assert mean2.shape == (300, num_actions)
    assert jnp.allclose(mean2, ref_forward(state2), atol=1e-5, rtol=1e-5)

    print("KERNEL_OK")
</pallas_src>

<mosaic_0001>
module attributes {stable_mosaic.version = 11 : i64} {
  func.func @_policy_kernel(%arg0: i32, %arg1: memref<256x16xf32, #tpu.memory_space<vmem>>, %arg2: memref<32x16xf32, #tpu.memory_space<vmem>>, %arg3: memref<32x1xf32, #tpu.memory_space<vmem>>, %arg4: memref<32x32xf32, #tpu.memory_space<vmem>>, %arg5: memref<32x1xf32, #tpu.memory_space<vmem>>, %arg6: memref<8x32xf32, #tpu.memory_space<vmem>>, %arg7: memref<8x1xf32, #tpu.memory_space<vmem>>, %arg8: memref<8x256xf32, #tpu.memory_space<vmem>>) attributes {dimension_semantics = [#tpu.dimension_semantics<parallel>], iteration_bounds = array<i64: 2>, scalar_prefetch = 0 : i64, scratch_operands = 0 : i64, tpu.core_type = #tpu.core_type<tc>, window_params = [{transform_indices = @transform_0, window_bounds = array<i64: 256, 16>}, {pipeline_mode = #tpu.pipeline_mode<synchronous>, transform_indices = @transform_1, window_bounds = array<i64: 32, 16>}, {pipeline_mode = #tpu.pipeline_mode<synchronous>, transform_indices = @transform_2, window_bounds = array<i64: 32, 1>}, {pipeline_mode = #tpu.pipeline_mode<synchronous>, transform_indices = @transform_3, window_bounds = array<i64: 32, 32>}, {pipeline_mode = #tpu.pipeline_mode<synchronous>, transform_indices = @transform_4, window_bounds = array<i64: 32, 1>}, {pipeline_mode = #tpu.pipeline_mode<synchronous>, transform_indices = @transform_5, window_bounds = array<i64: 8, 32>}, {pipeline_mode = #tpu.pipeline_mode<synchronous>, transform_indices = @transform_6, window_bounds = array<i64: 8, 1>}, {transform_indices = @transform_7, window_bounds = array<i64: 8, 256>}]} {
    %c0 = arith.constant 0 : index
    %c0_0 = arith.constant 0 : index
    %0 = vector.load %arg1[%c0, %c0_0] : memref<256x16xf32, #tpu.memory_space<vmem>>, vector<256x16xf32>
    %c0_1 = arith.constant 0 : index
    %c0_2 = arith.constant 0 : index
    %1 = vector.load %arg2[%c0_1, %c0_2] : memref<32x16xf32, #tpu.memory_space<vmem>>, vector<32x16xf32>
    %cst = arith.constant dense<0.000000e+00> : vector<32x256xf32>
    %2 = tpu.matmul %1, %0, %cst {dimension_numbers = #tpu.dot_dimension_numbers<[1], [1], [0], [0], [0, 0, 1, 0], [], []>} : vector<32x16xf32>, vector<256x16xf32>, vector<32x256xf32> -> vector<32x256xf32>
    %c0_3 = arith.constant 0 : index
    %c0_4 = arith.constant 0 : index
    %3 = vector.load %arg3[%c0_3, %c0_4] : memref<32x1xf32, #tpu.memory_space<vmem>>, vector<32x1xf32>
    %4 = vector.broadcast %3 : vector<32x1xf32> to vector<32x256xf32>
    %5 = arith.addf %2, %4 : vector<32x256xf32>
    %cst_5 = arith.constant 0.000000e+00 : f32
    %6 = vector.broadcast %cst_5 : f32 to vector<32x256xf32>
    %7 = arith.maximumf %5, %6 : vector<32x256xf32>
    %c0_6 = arith.constant 0 : index
    %c0_7 = arith.constant 0 : index
    %8 = vector.load %arg4[%c0_6, %c0_7] : memref<32x32xf32, #tpu.memory_space<vmem>>, vector<32x32xf32>
    %cst_8 = arith.constant dense<0.000000e+00> : vector<32x256xf32>
    %9 = tpu.matmul %8, %7, %cst_8 {dimension_numbers = #tpu.dot_dimension_numbers<[1], [0], [0], [1], [0, 0, 1, 1], [], []>} : vector<32x32xf32>, vector<32x256xf32>, vector<32x256xf32> -> vector<32x256xf32>
    %c0_9 = arith.constant 0 : index
    %c0_10 = arith.constant 0 : index
    %10 = vector.load %arg5[%c0_9, %c0_10] : memref<32x1xf32, #tpu.memory_space<vmem>>, vector<32x1xf32>
    %11 = vector.broadcast %10 : vector<32x1xf32> to vector<32x256xf32>
    %12 = arith.addf %9, %11 : vector<32x256xf32>
    %cst_11 = arith.constant 0.000000e+00 : f32
    %13 = vector.broadcast %cst_11 : f32 to vector<32x256xf32>
    %14 = arith.maximumf %12, %13 : vector<32x256xf32>
    %c0_12 = arith.constant 0 : index
    %c0_13 = arith.constant 0 : index
    %15 = vector.load %arg6[%c0_12, %c0_13] : memref<8x32xf32, #tpu.memory_space<vmem>>, vector<8x32xf32>
    %cst_14 = arith.constant dense<0.000000e+00> : vector<8x256xf32>
    %16 = tpu.matmul %15, %14, %cst_14 {dimension_numbers = #tpu.dot_dimension_numbers<[1], [0], [0], [1], [0, 0, 1, 1], [], []>} : vector<8x32xf32>, vector<32x256xf32>, vector<8x256xf32> -> vector<8x256xf32>
    %c0_15 = arith.constant 0 : index
    %c0_16 = arith.constant 0 : index
    %17 = vector.load %arg7[%c0_15, %c0_16] : memref<8x1xf32, #tpu.memory_space<vmem>>, vector<8x1xf32>
    %18 = vector.broadcast %17 : vector<8x1xf32> to vector<8x256xf32>
    %19 = arith.addf %16, %18 : vector<8x256xf32>
    %20 = math.tanh %19 : vector<8x256xf32>
    %c0_17 = arith.constant 0 : index
    %c0_18 = arith.constant 0 : index
    %21 = vector.load %arg8[%c0_17, %c0_18] : memref<8x256xf32, #tpu.memory_space<vmem>>, vector<8x256xf32>
    tpu.vector_store %arg8[%c0_17, %c0_18], %20 {strides = array<i32>} : memref<8x256xf32, #tpu.memory_space<vmem>>, vector<8x256xf32>,
    return
  }
  func.func @transform_0(%arg0: i32) -> (i32, i32) {
    %c0_i32 = arith.constant 0 : i32
    %c0_i32_0 = arith.constant 0 : i32
    return %arg0, %c0_i32 : i32, i32
  }
  func.func @transform_1(%arg0: i32) -> (i32, i32) {
    %c0_i32 = arith.constant 0 : i32
    %c0_i32_0 = arith.constant 0 : i32
    %c0_i32_1 = arith.constant 0 : i32
    return %c0_i32, %c0_i32_0 : i32, i32
  }
  func.func @transform_2(%arg0: i32) -> (i32, i32) {
    %c0_i32 = arith.constant 0 : i32
    %c0_i32_0 = arith.constant 0 : i32
    %c0_i32_1 = arith.constant 0 : i32
    return %c0_i32, %c0_i32_0 : i32, i32
  }
  func.func @transform_3(%arg0: i32) -> (i32, i32) {
    %c0_i32 = arith.constant 0 : i32
    %c0_i32_0 = arith.constant 0 : i32
    %c0_i32_1 = arith.constant 0 : i32
    return %c0_i32, %c0_i32_0 : i32, i32
  }
  func.func @transform_4(%arg0: i32) -> (i32, i32) {
    %c0_i32 = arith.constant 0 : i32
    %c0_i32_0 = arith.constant 0 : i32
    %c0_i32_1 = arith.constant 0 : i32
    return %c0_i32, %c0_i32_0 : i32, i32
  }
  func.func @transform_5(%arg0: i32) -> (i32, i32) {
    %c0_i32 = arith.constant 0 : i32
    %c0_i32_0 = arith.constant 0 : i32
    %c0_i32_1 = arith.constant 0 : i32
    return %c0_i32, %c0_i32_0 : i32, i32
  }
  func.func @transform_6(%arg0: i32) -> (i32, i32) {
    %c0_i32 = arith.constant 0 : i32
    %c0_i32_0 = arith.constant 0 : i32
    %c0_i32_1 = arith.constant 0 : i32
    return %c0_i32, %c0_i32_0 : i32, i32
  }
  func.func @transform_7(%arg0: i32) -> (i32, i32) {
    %c0_i32 = arith.constant 0 : i32
    %c0_i32_0 = arith.constant 0 : i32
    return %c0_i32, %arg0 : i32, i32
  }
}

</mosaic_0001>

<bundles_post_ra>
// kernel: tpu_custom_call.1
= control target key start
LH: loop header
LB: loop body
LE: loop exit
PB: predicated region body
PF: predicated region fallthrough
CT: control target
= control target key end

     0   :  { %12 = vsyncpa [#allocation3], 0  ;;  %s1318_s0 = inlined_call_operand.vmem [shape: f32[512,16], index: 0, kind: input, shape index: {}]   ;;  %s1319_s1 = inlined_call_operand.vmem [shape: f32[32,16], index: 1, kind: input, shape index: {}]   ;;  %s1320_s2 = inlined_call_operand.vmem [shape: f32[32,1], index: 2, kind: input, shape index: {}]   ;;  %s1321_s3 = inlined_call_operand.vmem [shape: f32[32,32], index: 3, kind: input, shape index: {}]   ;;  %s1322_s4 = inlined_call_operand.vmem [shape: f32[32,1], index: 4, kind: input, shape index: {}]   ;;  %s1323_s5 = inlined_call_operand.vmem [shape: f32[8,32], index: 5, kind: input, shape index: {}]   ;;  %s1324_s6 = inlined_call_operand.vmem [shape: f32[8,1], index: 6, kind: input, shape index: {}]   ;;  %s1325_s7 = inlined_call_operand.hbm [shape: f32[8,512], index: 7, kind: output, shape index: {}]  }
   0x1   :  { %14 = vsyncpa [#allocation3 + $0x1], 0  ;;  %s1089_s24 = smov 0   ;;  %s1091_s25 = smov 0  }
   0x2   :  { %s1093_s26 = smov 0   ;;  %s1095_s27 = smov 0  }
   0x3 LB: > { %s1110_s28 = sadd.s32 4294967295, %s1044_s27   ;;  %s843_s29 = sadd.s32 4294967294, %s1044_s27   ;;  %s1044_s27 = sphi %s1095_s27, %s1331_s27   ;;  %s1040_s26 = sphi %s1093_s26, %s1330_s26   ;;  %s1036_s25 = sphi %s1091_s25, %s1329_s25   ;;  %s1032_s24 = sphi %s1089_s24, %s1328_s24  }
   0x4   : > { %s1114_s30 = sadd.s32 1, %s1044_s27   ;;  %s179_s8 = sadd.s32 1, %s1040_s26 }
   0x5   : > { %s176_s9 = ssub.s32 %s1044_s27, %s1114_s30  ;;  %p189_p0 = scmp.ne.s32.totalorder %s1040_s26, %s1036_s25 }
   0x6   : > { %p177_p1 = scmp.eq.s32.totalorder %s176_s9, 0  ;;  %p190_p2 = scmp.eq.s32.totalorder %s1110_s28, 1 }
   0x7   : > { %p195_p3 = scmp.ne.s32.totalorder %s1036_s25, %s1032_s24  ;;  %p196_p4 = scmp.eq.s32.totalorder %s843_s29, 1 }
   0x8   : > { %s1125_s10 = scalar_select %p177_p1, %s1040_s26, %s179_s8  }
   0x9   : > { %p1127_p5 = por %p190_p2, %p189_p0  ;;  %p1131_p6 = por %p196_p4, %p195_p3 }
   0xa   : > { %p846_p7 = scmp.ge.s32.totalorder %s1044_s27, 1  ;;  %p241_p8 = scmp.lt.s32.totalorder %s1044_s27, 3 }
   0xc   : > { %p242_p9 = pnand %p846_p7, %p241_p8 }
   0xd   : > { %s848_s13 = sshll.u32 (!%p242_p9), %s1110_s28, 5  ;;  %s270_s9 = sand.u32 (!%p242_p9), 1, %s1036_s25  }
   0xe   : > { %245 = sbr.rel (%p242_p9) target bundleno = 749 (0x2ed), region = 48  ;;  %p274_p10 = scmp.lt.s32.totalorder (!%p242_p9), %s848_s13, 63 }
   0xf   : > { %s847_s15 = sshll.u32 (!%p242_p9), %s270_s9, 4  ;;  %s770_s20 = scalar_lea.sflag (!%p242_p9), [#allocation3], %s270_s9 }
  0x10   : > { %s272_s16 = scalar_lea.vmem (!%p242_p9), [#allocation2], %s847_s15  ;;  %s1048_s22 = smov (!%p242_p9), [#allocation2]  }
  0x13   : > { %vm340_vm0 = vcmask 130048   ;;  %v1141_v0 = vld [vmem:[%s1319_s1] sm:$0xff]  ;;  %v1046_v1 = vmov 0   ;;  %v319_v2 = vld [vmem:[%s1320_s2 + $0x18] sm:$0xff]  ;;  %v317_v3 = vld [vmem:[%s1320_s2 + $0x8] sm:$0xff]  ;;  %s1333_s13 = smov (!%p274_p10, %s848_s13), 63 }
  0x14   : > { %929 = vmatprep.mubr.msk.f32.mxu0 %vm340_vm0, %v1141_v0  ;;  %979 = vset.pattern.permute.xlu1 %v1046_v1  ;;  %v316_v4 = vld [vmem:[%s1320_s2] sm:$0xff]  ;;  %v318_v5 = vld [vmem:[%s1320_s2 + $0x10] sm:$0xff]  ;;  %s849_s29 = sshll.u32 %s1333_s13, 3  ;;  %v553_v10 = vld [vmem:[%s1322_s4 + $0x18] sm:$0xff]  ;;  %v1047_v46 = vmov 0.0   ;;  %vm574_vm1 = vcmask 261120  }
  0x15   : > { %978 = vset.pattern.permute.xlu0 %v1046_v1  ;;  %327 = vperm.xlu1 %979, %v317_v3   ;;  %s1160_s14 = scalar_lea.vmem %s1318_s0, %s849_s29  ;;  %v552_v6 = vld [vmem:[%s1322_s4 + $0x10] sm:$0xff]  ;;  %v550_v13 = vld [vmem:[%s1322_s4] sm:$0xff]  ;;  %v551_v14 = vld [vmem:[%s1322_s4 + $0x8] sm:$0xff]  ;;  %s784_s13 = sshll.u32 %s272_s16, 4  ;;  %s785_s13 = int_to_ptr.vmem [resolvable:$true] %s784_s13 }
  0x16   : > { %337 = vperm.xlu0 %978, %v319_v2   ;;  %v311_v7 = vld [vmem:[%s1160_s14 + $0xf8] sm:$0xff]  ;;  %v310_v9 = vld [vmem:[%s1160_s14 + $0xf0] sm:$0xff]  ;;  %v309_v12 = vld [vmem:[%s1160_s14 + $0xe8] sm:$0xff]  ;;  %651 = vmatprep.mubr.f32.mxu1 %v1047_v46  ;;  %s984_s21 = scalar_lea.vmem %s785_s13, 256 }
  0x17   : > { %v295_v8 = vld [vmem:[%s1160_s14 + $0x78] sm:$0xff]  ;;  %897 = vmatprep.subr.msk.mxu0 %vm340_vm0, %v311_v7  ;;  %v294_v11 = vld [vmem:[%s1160_s14 + $0x70] sm:$0xff]  ;;  %v293_v15 = vld [vmem:[%s1160_s14 + $0x68] sm:$0xff]  ;;  %p985_p11 = scmp.ne.s32.totalorder %s785_s13, %s984_s21 }
  0x18   : > { %898 = vmatpush3.xpose.msk.msra.mxu0 %vm340_vm0, %v295_v8  ;;  %v308_v16 = vld [vmem:[%s1160_s14 + $0xe0] sm:$0xff]  ;;  %v307_v19 = vld [vmem:[%s1160_s14 + $0xd8] sm:$0xff]  ;;  %v306_v21 = vld [vmem:[%s1160_s14 + $0xd0] sm:$0xff] }
  0x19   : > { %322 = vperm.xlu1 %979, %v316_v4   ;;  %899 = vmatprep.subr.msk.mxu0 %vm340_vm0, %v310_v9  ;;  %v685_v17 = vld [vmem:[%s1324_s6] sm:$0xff]  ;;  %v291_v20 = vld [vmem:[%s1160_s14 + $0x58] sm:$0xff]  ;;  %v290_v22 = vld [vmem:[%s1160_s14 + $0x50] sm:$0xff]  ;;  %p986_p12 = pnand %p985_p11, %p1127_p5 }
  0x1a   : > { %332 = vperm.xlu0 %978, %v318_v5   ;;  %v292_v18 = vld [vmem:[%s1160_s14 + $0x60] sm:$0xff]  ;;  %v305_v23 = vld [vmem:[%s1160_s14 + $0xc8] sm:$0xff]  ;;  %v303_v27 = vld [vmem:[%s1160_s14 + $0xb8] sm:$0xff] }
  0x1b   : > { %v289_v24 = vld [vmem:[%s1160_s14 + $0x48] sm:$0xff]  ;;  %v304_v25 = vld [vmem:[%s1160_s14 + $0xc0] sm:$0xff]  ;;  %v287_v28 = vld [vmem:[%s1160_s14 + $0x38] sm:$0xff]  ;;  %p987_p13 = pneg %p986_p12 }
  0x1c   : > { %900 = vmatpush3.xpose.msk.msra.mxu0 %vm340_vm0, %v294_v11  ;;  %v288_v26 = vld [vmem:[%s1160_s14 + $0x40] sm:$0xff]  ;;  %v302_v29 = vld [vmem:[%s1160_s14 + $0xb0] sm:$0xff]  ;;  %v301_v31 = vld [vmem:[%s1160_s14 + $0xa8] sm:$0xff] }
  0x1d   : > { %566 = vperm.xlu1 %979, %v552_v6   ;;  %901 = vmatprep.subr.msk.mxu0 %vm340_vm0, %v309_v12  ;;  %v286_v30 = vld [vmem:[%s1160_s14 + $0x30] sm:$0xff]  ;;  %v285_v32 = vld [vmem:[%s1160_s14 + $0x28] sm:$0xff]  ;;  %v300_v33 = vld [vmem:[%s1160_s14 + $0xa0] sm:$0xff] }
  0x1e   : > { %571 = vperm.xlu0 %978, %v553_v10   ;;  %v284_v34 = vld [vmem:[%s1160_s14 + $0x20] sm:$0xff]  ;;  %v299_v35 = vld [vmem:[%s1160_s14 + $0x98] sm:$0xff]  ;;  %v298_v37 = vld [vmem:[%s1160_s14 + $0x90] sm:$0xff] }
  0x1f   : > { %v283_v36 = vld [vmem:[%s1160_s14 + $0x18] sm:$0xff]  ;;  %v282_v38 = vld [vmem:[%s1160_s14 + $0x10] sm:$0xff]  ;;  %v297_v39 = vld [vmem:[%s1160_s14 + $0x88] sm:$0xff] }
  0x20   : > { %902 = vmatpush3.xpose.msk.msra.mxu0 %vm340_vm0, %v293_v15  ;;  %v281_v40 = vld [vmem:[%s1160_s14 + $0x8] sm:$0xff]  ;;  %v296_v41 = vld [vmem:[%s1160_s14 + $0x80] sm:$0xff]  ;;  %v314_v44 = vld [vmem:[%s1319_s1 + $0x10] sm:$0xff] }
  0x21   : > { %556 = vperm.xlu1 %979, %v550_v13   ;;  %903 = vmatprep.subr.msk.mxu0 %vm340_vm0, %v308_v16  ;;  %v280_v42 = vld [vmem:[%s1160_s14] sm:$0xff]  ;;  %v313_v43 = vld [vmem:[%s1319_s1 + $0x8] sm:$0xff]  ;;  %v315_v45 = vld [vmem:[%s1319_s1 + $0x18] sm:$0xff]  ;;  %s896_s14 = sshll.u32 %s1110_s28, 8  ;;  %s988_s28 = sshll.u32 %s1048_s22, 4  ;;  %s989_s28 = int_to_ptr.vmem [resolvable:$false] %s988_s28 }
  0x22   : > { %561 = vperm.xlu0 %978, %v551_v14   ;;  %v546_v11 = vld [vmem:[%s1321_s3] sm:$0xff]  ;;  %v547_v12 = vld [vmem:[%s1321_s3 + $0x8] sm:$0xff]  ;;  %v548_v13 = vld [vmem:[%s1321_s3 + $0x10] sm:$0xff]  ;;  %s1283_s19 = scalar_lea.hbm %s1325_s7, %s896_s14  ;;  %s990_s23 = scalar_lea.vmem %s989_s28, 512 }
  0x23   : > { %v549_v14 = vld [vmem:[%s1321_s3 + $0x18] sm:$0xff]  ;;  %p991_p0 = scmp.lt.s32.totalorder %s785_s13, %s989_s28  ;;  %p992_p1 = scmp.lt.s32.totalorder %s990_s23, %s984_s21 }
  0x24   : > { %904 = vmatpush3.xpose.msk.msra.mxu0 %vm340_vm0, %v292_v18 }
  0x25   : > { %905 = vmatprep.subr.msk.mxu0 %vm340_vm0, %v307_v19  ;;  %p993_p2 = por %p992_p1, %p991_p0 }
  0x26   : > { %688 = vperm.xlu0 %978, %v685_v17  }
  0x27   : > { %p994_p3 = pnand %p993_p2, %p987_p13 }
  0x28   : > { %906 = vmatpush3.xpose.msk.msra.mxu0 %vm340_vm0, %v291_v20 }
  0x29   : > { %907 = vmatprep.subr.msk.mxu0 %vm340_vm0, %v306_v21 }
  0x2c   : > { %908 = vmatpush3.xpose.msk.msra.mxu0 %vm340_vm0, %v290_v22 }
  0x2d   : > { %909 = vmatprep.subr.msk.mxu0 %vm340_vm0, %v305_v23 }
  0x30   : > { %910 = vmatpush3.xpose.msk.msra.mxu0 %vm340_vm0, %v289_v24 }
  0x31   : > { %911 = vmatprep.subr.msk.mxu0 %vm340_vm0, %v304_v25 }
  0x34   : > { %912 = vmatpush3.xpose.msk.msra.mxu0 %vm340_vm0, %v288_v26 }
  0x35   : > { %913 = vmatprep.subr.msk.mxu0 %vm340_vm0, %v303_v27 }
  0x38   : > { %914 = vmatpush3.xpose.msk.msra.mxu0 %vm340_vm0, %v287_v28 }
  0x39   : > { %915 = vmatprep.subr.msk.mxu0 %vm340_vm0, %v302_v29 }
  0x3c   : > { %916 = vmatpush3.xpose.msk.msra.mxu0 %vm340_vm0, %v286_v30 }
  0x3d   : > { %917 = vmatprep.subr.msk.mxu0 %vm340_vm0, %v301_v31 }
  0x40   : > { %918 = vmatpush3.xpose.msk.msra.mxu0 %vm340_vm0, %v285_v32 }
  0x41   : > { %919 = vmatprep.subr.msk.mxu0 %vm340_vm0, %v300_v33 }
  0x44   : > { %920 = vmatpush3.xpose.msk.msra.mxu0 %vm340_vm0, %v284_v34 }
  0x45   : > { %921 = vmatprep.subr.msk.mxu0 %vm340_vm0, %v299_v35 }
  0x48   : > { %922 = vmatpush3.xpose.msk.msra.mxu0 %vm340_vm0, %v283_v36 }
  0x49   : > { %923 = vmatprep.subr.msk.mxu0 %vm340_vm0, %v298_v37 }
  0x4c   : > { %924 = vmatpush3.xpose.msk.msra.mxu0 %vm340_vm0, %v282_v38 }
  0x4d   : > { %925 = vmatprep.subr.msk.mxu0 %vm340_vm0, %v297_v39 }
  0x50   : > { %926 = vmatpush3.xpose.msk.msra.mxu0 %vm340_vm0, %v281_v40 }
  0x51   : > { %927 = vmatprep.subr.msk.mxu0 %vm340_vm0, %v296_v41 }
  0x54   : > { %928 = vmatpush3.xpose.msk.msra.mxu0 %vm340_vm0, %v280_v42 }
  0x57   : > { %930 = vmatmul.mubr.msk.f32.vlgmr.msra.gmra.mxu0 %vm340_vm0, %v1141_v0 }
  0x58   : > { %931 = vmatprep.mubr.msk.f32.mxu0 %vm340_vm0, %v313_v43 }
  0x5b   : > { %932 = vmatmul.mubr.msk.f32.gmra.mxu0 %vm340_vm0, %v313_v43  ;;  %v684_v43 = vld [vmem:[%s1323_s5] sm:$0xff] }
  0x5c   : > { %933 = vmatprep.mubr.msk.f32.mxu0 %vm340_vm0, %v314_v44 }
  0x5f   : > { %934 = vmatmul.mubr.msk.f32.gmra.mxu0 %vm340_vm0, %v314_v44 }
  0x60   : > { %935 = vmatprep.mubr.msk.f32.mxu0 %vm340_vm0, %v315_v45 }
  0x63   : > { %936 = vmatmul.mubr.msk.f32.gmra.mxu0 %vm340_vm0, %v315_v45 }
  0x90   : > { %v328_v54 = vpop.permute.xlu1 %327 }
  0x91   : > { %v338_v51 = vpop.permute.xlu0 %337 }
  0x94   : > { %v323_v62 = vpop.permute.xlu1 %322 }
  0x95   : > { %v333_v56 = vpop.permute.xlu0 %332 }
  0x98   : > { %v567_v22 = vpop.permute.xlu1 %566 }
  0x99   : > { %v572_v20 = vpop.permute.xlu0 %571 }
  0x9c   : > { %v557_v32 = vpop.permute.xlu1 %556 }
  0x9d   : > { %v562_v28 = vpop.permute.xlu0 %561 }
  0xa1   : > { %v689_v44 = vpop.permute.xlu0 %688 }
 0x117   : > { %v515_v47 = vpop.f32.mrf.mxu0 }
 0x118   : > { %v516_v5 = vadd.f32 %v515_v47, %v323_v62 }
 0x119   : > { %v517_v48 = vpop.f32.mrf.mxu0 }
 0x11a   : > { %v518_v3 = vadd.f32 %v517_v48, %v323_v62  ;;  %v538_v10 = vmax.f32 %v516_v5, 0.0 }
 0x11b   : > { %v521_v49 = vpop.f32.mrf.mxu0 }
 0x11c   : > { %v522_v1 = vadd.f32 %v521_v49, %v328_v54  ;;  %v539_v9 = vmax.f32 %v518_v3, 0.0 }
 0x11d   : > { %v523_v50 = vpop.f32.mrf.mxu0 }
 0x11e   : > { %v524_v63 = vadd.f32 %v523_v50, %v328_v54  ;;  %v540_v8 = vmax.f32 %v522_v1, 0.0 }
 0x11f   : > { %v527_v52 = vpop.f32.mrf.mxu0 }
 0x120   : > { %v528_v61 = vadd.f32 %v527_v52, %v333_v56  ;;  %v541_v7 = vmax.f32 %v524_v63, 0.0 }
 0x121   : > { %v529_v53 = vpop.f32.mrf.mxu0 }
 0x122   : > { %v530_v59 = vadd.f32 %v529_v53, %v333_v56  ;;  %v542_v6 = vmax.f32 %v528_v61, 0.0 }
 0x123   : > { %v533_v55 = vpop.f32.mrf.mxu0 }
 0x124   : > { %v534_v57 = vadd.f32 %v533_v55, %v338_v51  ;;  %v543_v4 = vmax.f32 %v530_v59, 0.0 }
 0x125   : > { %v535_v58 = vpop.f32.mrf.mxu0 }
 0x126   : > { %v536_v60 = vadd.f32 %v535_v58, %v338_v51  ;;  %v544_v2 = vmax.f32 %v534_v57, 0.0 }
 0x128   : > { %v545_v0 = vmax.f32 %v536_v60, 0.0 }
 0x12a   : > { %611 = vmatprep.subr.mxu1 %v545_v0 }
 0x12b   : > { %612 = vmatpush1.msra.mxu1 %v544_v2 }
 0x12c   : > { %613 = vmatprep.subr.mxu1 %v543_v4 }
 0x12d   : > { %614 = vmatpush1.msra.mxu1 %v542_v6 }
 0x12e   : > { %615 = vmatprep.subr.mxu1 %v541_v7 }
 0x12f   : > { %616 = vmatpush1.msra.mxu1 %v540_v8 }
 0x130   : > { %617 = vmatprep.subr.mxu1 %v539_v9 }
 0x131   : > { %618 = vmatpush1.msra.mxu1 %v538_v10 }
 0x132   : > { %886 = vmatmul.mubr.msk.f32.vlgmr.msra.gmra.mxu1 %vm574_vm1, %v546_v11 }
 0x133   : > { %657 = vmatprep.mubr.f32.mxu1 %v1047_v46 }
 0x136   : > { %887 = vmatmul.mubr.msk.f32.gmra.mxu1 %vm574_vm1, %v547_v12 }
 0x137   : > { %663 = vmatprep.mubr.f32.mxu1 %v1047_v46 }
 0x13a   : > { %888 = vmatmul.mubr.msk.f32.gmra.mxu1 %vm574_vm1, %v548_v13 }
 0x13b   : > { %669 = vmatprep.mubr.f32.mxu1 %v1047_v46 }
 0x13e   : > { %889 = vmatmul.mubr.msk.f32.gmra.mxu1 %vm574_vm1, %v549_v14 }
 0x13f   : > { %758 = vmatprep.mubr.f32.mxu1 %v1047_v46 }
 0x1f2   : > { %v653_v15 = vpop.f32.mrf.mxu1 }
 0x1f3   : > { %v654_v37 = vadd.f32 %v653_v15, %v557_v32 }
 0x1f4   : > { %v655_v16 = vpop.f32.mrf.mxu1 }
 0x1f5   : > { %v656_v35 = vadd.f32 %v655_v16, %v557_v32  ;;  %v676_v42 = vmax.f32 %v654_v37, 0.0 }
 0x1f6   : > { %v659_v17 = vpop.f32.mrf.mxu1 }
 0x1f7   : > { %v660_v33 = vadd.f32 %v659_v17, %v562_v28  ;;  %v677_v41 = vmax.f32 %v656_v35, 0.0 }
 0x1f8   : > { %v661_v18 = vpop.f32.mrf.mxu1 }
 0x1f9   : > { %v662_v30 = vadd.f32 %v661_v18, %v562_v28  ;;  %v678_v40 = vmax.f32 %v660_v33, 0.0 }
 0x1fa   : > { %v665_v19 = vpop.f32.mrf.mxu1 }
 0x1fb   : > { %v666_v29 = vadd.f32 %v665_v19, %v567_v22  ;;  %v679_v39 = vmax.f32 %v662_v30, 0.0 }
 0x1fc   : > { %v667_v21 = vpop.f32.mrf.mxu1 }
 0x1fd   : > { %v668_v26 = vadd.f32 %v667_v21, %v567_v22  ;;  %v680_v38 = vmax.f32 %v666_v29, 0.0 }
 0x1fe   : > { %v671_v23 = vpop.f32.mrf.mxu1 }
 0x1ff   : > { %v672_v24 = vadd.f32 %v671_v23, %v572_v20  ;;  %v681_v36 = vmax.f32 %v668_v26, 0.0 }
 0x200   : > { %v673_v25 = vpop.f32.mrf.mxu1 }
 0x201   : > { %v674_v27 = vadd.f32 %v673_v25, %v572_v20  ;;  %v682_v34 = vmax.f32 %v672_v24, 0.0 }
 0x203   : > { %v683_v31 = vmax.f32 %v674_v27, 0.0 }
 0x205   : > { %718 = vmatprep.subr.mxu1 %v683_v31 }
 0x206   : > { %719 = vmatpush1.msra.mxu1 %v682_v34 }
 0x207   : > { %720 = vmatprep.subr.mxu1 %v681_v36 }
 0x208   : > { %721 = vmatpush1.msra.mxu1 %v680_v38 }
 0x209   : > { %722 = vmatprep.subr.mxu1 %v679_v39 }
 0x20a   : > { %723 = vmatpush1.msra.mxu1 %v678_v40 }
 0x20b   : > { %724 = vmatprep.subr.mxu1 %v677_v41 }
 0x20c   : > { %725 = vmatpush1.msra.mxu1 %v676_v42 }
 0x20d   : > { %890 = vmatmul.mubr.msk.f32.vlgmr.msra.gmra.mxu1 %vm574_vm1, %v684_v43 }
 0x2cd   : > { %v760_v45 = vpop.f32.mrf.mxu1 }
 0x2ce   : > { %v761_v46 = vadd.f32 %v760_v45, %v689_v44 }
 0x2cf   : > { %v762_v47 = vpop.f32.mrf.mxu1 }
 0x2d0   : > { %980 = vtanh.f32 %v761_v46  ;;  %v763_v48 = vadd.f32 %v762_v47, %v689_v44 }
 0x2d2   : > { %982 = vtanh.f32 %v763_v48 }
 0x2dd   : > { %v981_v49 = vpop.eup %980 }
 0x2de   : > { %767 = vst [vmem:[%s272_s16] sm:$0xff] %v981_v49 }
 0x2df   : > { %v983_v50 = vpop.eup %982 }
 0x2e0   : > { %768 = vst [vmem:[%s272_s16 + $0x8] sm:$0xff] %v983_v50 }
 0x2e1   : > { %997 = shalt.err (!%p994_p3)
}
 0x2e2   : > { %s998_s29 = scalar_lea.hbm %s1283_s19, 256  ;;  %s1002_s15 = scalar_lea.hbm %s1325_s7, 512 }
 0x2e3   : > { %p999_p4 = scmp.ne.s32.totalorder %s1283_s19, %s998_s29  ;;  %p1003_p9 = scmp.lt.s32.totalorder %s1283_s19, %s1325_s7 }
 0x2e4   : > { %p1004_p10 = scmp.lt.s32.totalorder %s1002_s15, %s998_s29 }
 0x2e5   : > { %p1000_p7 = pnand %p999_p4, %p1127_p5 }
 0x2e6   : > { %p1005_p11 = por %p1004_p10, %p1003_p9 }
 0x2e7   : > { %p1001_p8 = pneg %p1000_p7 }
 0x2e9   : > { %p1006_p12 = pnand %p1005_p11, %p1001_p8 }
 0x2eb   : > { %1009 = shalt.err (!%p1006_p12)
}
 0x2ec   : > { %937 = dma.vmem_to_hbm [thread:$0]  (%p1127_p5), %s785_s13, 256, %s1283_s19, %s770_s20  }
 0x2ed PF: > { %p943_p13 = scmp.ge.s32.totalorder %s1044_s27, 2  ;;  %s796_s17 = sand.u32 1, %s1032_s24  }
 0x2ee   : > { %s797_s18 = scalar_lea.sflag [#allocation3], %s796_s17 }
 0x2ef   : > { %p940_p0 = pnand %p943_p13, %p1131_p6 }
 0x2f1   : > { %p941_p1 = pneg %p940_p0 }
 0x2f3   : > { %1027 = dma.done.wait (%p941_p1), %s797_s18, 256  }
 0x2f4   : > { %1029 = vsyncadd (%p941_p1), %s797_s18, 4294967040  ;;  %p17_p2 = scmp.ge.s32.totalorder %s1114_s30, 4   ;;  %s1328_s24 = smov %s1036_s25 }
 0x2f5   : > { %s1329_s25 = smov %s1040_s26  ;;  %s1330_s26 = smov %s1125_s10 }
 0x2f6   : > { %s1331_s27 = smov %s1114_s30  ;;  %19 = sbr.rel (!%p17_p2) target bundleno = 3 (0x3), region = 83 }
 0x2fb   :  { %802 = vsyncpa [#allocation3], 1 }
 0x2fc   :  { %804 = vsyncpa [#allocation3 + $0x1], 1 }

</bundles_post_ra>
